<compile_context>
chip_gen: v6e
topology: v6e:2x2x1
jax: 0.10.0
libtpu: 0.0.40
codegen_flags: <defaults>
</compile_context>

<pallas_src>
import functools

import numpy as np
import jax
import jax.numpy as jnp
from jax.experimental import pallas as pl
from jax.experimental.pallas import tpu as pltpu


# bf16 would ~double MXU throughput on v6e/v7x but needs the validation tolerance
# relaxed to ~1e-2; kept f32 so the 1e-4 check against the lax.conv reference holds.
MATMUL_DTYPE = jnp.float32


# -----------------------------------------------------------------------------
# Fused kernel: the entire SeqCNN forward pass in one invocation.
# -----------------------------------------------------------------------------
def fused_seqcnn_kernel(*refs, num_layers, batch, length, pad, eps):
    """Ref layout (all whole-array VMEM blocks):
      refs[0]               valid-lane mask, (1, LANE) f32
      refs[1]               input slab, (Cin, LANE) f32; col n*Lp + p = sample n, pos p
      refs[2+4l .. 5+4l]    layer l: gamma (C,1), beta (C,1),
                            w (K, Cout, Cin) block-diagonal over groups, bias (Cout,1)
      refs[-1]              output slab, (Cout_last, LANE) f32 (same layout)
    """
    mask_ref, x_ref = refs[0], refs[1]
    o_ref = refs[-1]

    mask = mask_ref[...]                                  # (1, LANE)
    act = x_ref[...]                                      # (C, LANE) f32
    lane = act.shape[1]
    inv_nl = 1.0 / float(batch * length)

    for l in range(num_layers):
        g_ref, be_ref, w_ref, bi_ref = refs[2 + 4 * l: 6 + 4 * l]

        # ---- BatchNorm1d (training-mode batch stats), centered two-pass ----
        # Pad/tail columns are exactly zero, so the raw sum is over real samples only;
        # the centered moment is masked so those columns never contribute.
        mean = jnp.sum(act, axis=1, keepdims=True) * inv_nl            # (C, 1)
        xc = (act - mean) * mask                                       # pad cols -> 0
        var = jnp.sum(xc * xc, axis=1, keepdims=True) * inv_nl         # biased var
        scale = g_ref[...] * jax.lax.rsqrt(var + eps)                  # rsqrt -> EUP
        xn = (xc * scale + be_ref[...]) * mask                         # re-zero pads

        # ---- grouped Conv1d: per-tap accumulation, no im2col materialization ----
        # Tap k needs input column (col + k - pad); with per-sample conv padding baked
        # into the slab this is a single whole-slab lane rotation (XLU), and one
        # (Cout, Cin) @ (Cin, LANE) MXU matmul per tap covers every group at once
        # (weights are block-diagonal over groups).
        K = w_ref.shape[0]
        cout = w_ref.shape[1]
        xn_mm = xn.astype(MATMUL_DTYPE)
        acc = jnp.zeros((cout, lane), jnp.float32)
        for k in range(K):
            s = (pad - k) % lane
            xs = xn_mm if s == 0 else pltpu.roll(xn_mm, shift=s, axis=1)
            acc = acc + jnp.dot(w_ref[k], xs, preferred_element_type=jnp.float32)

        # ---- bias + ReLU fused; re-mask so the next layer's stats/conv stay exact ----
        act = jnp.maximum(acc + bi_ref[...], 0.0) * mask

    o_ref[...] = act.astype(o_ref.dtype)                  # lane-dense (LANE % 128 == 0)


# -----------------------------------------------------------------------------
# Wrapper: layout plumbing (all free XLA reshapes / pads) + single pallas_call.
# -----------------------------------------------------------------------------
def seqcnn_forward(x, layer_params, *, kernel, stride, pad, eps=1e-5):
    """x: (N, Cin, L) PyTorch NCL layout.  Returns (N, Cout_last, L_out)."""
    # TODO(synk): stride > 1 needs per-layer lane subsampling between fused layers;
    # TODO(synk): even kernel sizes change L_out and break the layer-invariant slab.
    assert stride == 1, "fused slab layout implemented for stride == 1 only"
    assert kernel % 2 == 1, "fused slab layout implemented for odd kernel sizes only"

    N, Cin, L = x.shape
    Lp = L + 2 * pad
    slab = N * Lp
    LANE = max(128, ((slab + 127) // 128) * 128)          # lane-dense, unmasked stores

    # Input slab: (Cin, LANE), per-sample conv padding embedded, tail zero-padded.
    x_slab = jnp.transpose(x, (1, 0, 2)).astype(jnp.float32)       # (Cin, N, L)
    x_slab = jnp.pad(x_slab, ((0, 0), (0, 0), (pad, pad)))         # conv zero padding
    x_slab = x_slab.reshape(Cin, slab)
    x_slab = jnp.pad(x_slab, ((0, 0), (0, LANE - slab)))           # lane padding

    # Valid-column mask (1 at real positions, 0 at conv-pad / lane-tail columns).
    col = np.arange(LANE)
    p = col % Lp
    valid = (col < slab) & (p >= pad) & (p < pad + L)
    mask = jnp.asarray(valid.astype(np.float32)[None, :])          # (1, LANE)

    inputs = [mask, x_slab]
    for prm in layer_params:
        gamma, beta, w, b, groups = prm['gamma'], prm['beta'], prm['w'], prm['b'], prm['groups']
        Cout, cin_g, K = w.shape
        C = gamma.shape[0]
        cout_g = Cout // groups
        # Block-diagonal per-tap weights: (K, Cout, C).  Built once here (XLA), never
        # re-sliced in the kernel; lets one matmul per tap cover all groups.
        wg = w.reshape(groups, cout_g, cin_g, K).astype(MATMUL_DTYPE)
        w_bd = jnp.zeros((K, Cout, C), MATMUL_DTYPE)
        for g in range(groups):
            w_bd = w_bd.at[:, g * cout_g:(g + 1) * cout_g,
                           g * cin_g:(g + 1) * cin_g].set(jnp.transpose(wg[g], (2, 0, 1)))
        inputs += [gamma.reshape(C, 1).astype(jnp.float32),
                   beta.reshape(C, 1).astype(jnp.float32),
                   w_bd,
                   b.reshape(Cout, 1).astype(jnp.float32)]

    Cout_last = layer_params[-1]['b'].shape[0]
    kernel_fn = functools.partial(fused_seqcnn_kernel,
                                  num_layers=len(layer_params),
                                  batch=N, length=L, pad=pad, eps=eps)

    out_slab = pl.pallas_call(
        kernel_fn,
        out_shape=jax.ShapeDtypeStruct((Cout_last, LANE), jnp.float32),
        # Single invocation, whole-array VMEM blocks, no grid and no scratch: the whole
        # network (a few tens of KB here) is VMEM-resident and the workload is
        # latency-bound.  TODO(synk): at larger shapes add a parallel lane-tile grid
        # axis (second TC on v7x) and set vmem_limit_bytes explicitly for 64 MiB VMEM.
    )(*inputs)

    # Slab -> (N, Cout, L): drop lane tail + conv padding (free row-major ops in XLA).
    out = out_slab[:, :slab].reshape(Cout_last, N, Lp)[:, :, pad:pad + L]
    return jnp.transpose(out, (1, 0, 2))


# -----------------------------------------------------------------------------
# Parameter construction (deterministic, mirrors SeqCNN.__init__ shapes).
# -----------------------------------------------------------------------------
def init_params(key, in_channels, groups, kernel, num_layers, channels):
    width = channels * in_channels
    params = []
    for l in range(num_layers):
        l1 = width * 2 ** l
        l2 = width * 2 ** (l + 1)
        if l == 0:
            l1 = in_channels
        g = l1 if groups == 0 else groups
        key, k1, k2, k3, k4 = jax.random.split(key, 5)
        gamma = jax.random.uniform(k1, (l1,), jnp.float32, 0.5, 1.5)
        beta = 0.1 * jax.random.normal(k2, (l1,), jnp.float32)
        fan_in = (l1 // g) * kernel
        bound = 1.0 / (fan_in ** 0.5)
        w = jax.random.uniform(k3, (l2, l1 // g, kernel), jnp.float32, -bound, bound)
        b = jax.random.uniform(k4, (l2,), jnp.float32, -bound, bound)
        params.append(dict(gamma=gamma, beta=beta, w=w, b=b, groups=g))
    return params


# -----------------------------------------------------------------------------
# Pure-JAX reference (numerical validation of the fused kernel).
# -----------------------------------------------------------------------------
def ref_layer(x, gamma, beta, w, b, *, groups, stride, pad, eps=1e-5):
    mean = x.mean(axis=(0, 2), keepdims=True)
    var = ((x - mean) ** 2).mean(axis=(0, 2), keepdims=True)
    xn = (x - mean) * jax.lax.rsqrt(var + eps) * gamma[None, :, None] + beta[None, :, None]
    out = jax.lax.conv_general_dilated(
        xn, w, window_strides=(stride,), padding=[(pad, pad)],
        dimension_numbers=('NCH', 'OIH', 'NCH'), feature_group_count=groups)
    out = out + b[None, :, None]
    return jnp.maximum(out, 0.0)


if __name__ == "__main__":
    # SeqCNN hyper-parameters (small, consistent with the module's constructor)
    in_channels, groups, kernel, num_layers, stride, channels = 4, 2, 3, 2, 1, 2
    pad = int(kernel / 2)

    key = jax.random.PRNGKey(0)
    kx, kp = jax.random.split(key)
    N, L = 2, 16
    x = jax.random.normal(kx, (N, in_channels, L), jnp.float32)   # NCL, PyTorch layout
    params = init_params(kp, in_channels, groups, kernel, num_layers, channels)

    # Fused Pallas path: one pallas_call for the whole network.
    y = seqcnn_forward(x, params, kernel=kernel, stride=stride, pad=pad)

    # Pure-JAX reference path.
    y_ref = x
    for prm in params:
        y_ref = ref_layer(y_ref, prm['gamma'], prm['beta'], prm['w'], prm['b'],
                          groups=prm['groups'], stride=stride, pad=pad)

    y = jax.block_until_ready(y)
    y_ref = jax.block_until_ready(y_ref)

    width = channels * in_channels
    expected_cout = width * 2 ** num_layers
    assert y.shape == (N, expected_cout, L), y.shape
    assert jnp.allclose(y, y_ref, atol=1e-4, rtol=1e-4), \
        f"max abs err = {jnp.max(jnp.abs(y - y_ref))}"
    print("KERNEL_OK")
</pallas_src>

<mosaic_0001>
module attributes {stable_mosaic.version = 11 : i64} {
  func.func @fused_seqcnn_kernel(%arg0: memref<1x128xf32, #tpu.memory_space<vmem>>, %arg1: memref<4x128xf32, #tpu.memory_space<vmem>>, %arg2: memref<4x1xf32, #tpu.memory_space<vmem>>, %arg3: memref<4x1xf32, #tpu.memory_space<vmem>>, %arg4: memref<3x16x4xf32, #tpu.memory_space<vmem>>, %arg5: memref<16x1xf32, #tpu.memory_space<vmem>>, %arg6: memref<16x1xf32, #tpu.memory_space<vmem>>, %arg7: memref<16x1xf32, #tpu.memory_space<vmem>>, %arg8: memref<3x32x16xf32, #tpu.memory_space<vmem>>, %arg9: memref<32x1xf32, #tpu.memory_space<vmem>>, %arg10: memref<32x128xf32, #tpu.memory_space<vmem>>) attributes {dimension_semantics = [], scalar_prefetch = 0 : i64, scratch_operands = 0 : i64, tpu.core_type = #tpu.core_type<tc>} {
    %c0 = arith.constant 0 : index
    %c0_0 = arith.constant 0 : index
    %0 = vector.load %arg0[%c0, %c0_0] : memref<1x128xf32, #tpu.memory_space<vmem>>, vector<1x128xf32>
    %c0_1 = arith.constant 0 : index
    %c0_2 = arith.constant 0 : index
    %1 = vector.load %arg1[%c0_1, %c0_2] : memref<4x128xf32, #tpu.memory_space<vmem>>, vector<4x128xf32>
    %cst = arith.constant dense<0.000000e+00> : vector<4xf32>
    %2 = vector.multi_reduction <add>, %1, %cst [1] : vector<4x128xf32> to vector<4xf32>
    %3 = vector.shape_cast %2 : vector<4xf32> to vector<4x1xf32>
    %cst_3 = arith.constant 3.125000e-02 : f32
    %4 = vector.broadcast %cst_3 : f32 to vector<4x1xf32>
    %5 = arith.mulf %3, %4 : vector<4x1xf32>
    %6 = vector.broadcast %5 : vector<4x1xf32> to vector<4x128xf32>
    %7 = arith.subf %1, %6 : vector<4x128xf32>
    %8 = vector.broadcast %0 : vector<1x128xf32> to vector<4x128xf32>
    %9 = arith.mulf %7, %8 : vector<4x128xf32>
    %10 = arith.mulf %9, %9 : vector<4x128xf32>
    %cst_4 = arith.constant dense<0.000000e+00> : vector<4xf32>
    %11 = vector.multi_reduction <add>, %10, %cst_4 [1] : vector<4x128xf32> to vector<4xf32>
    %12 = vector.shape_cast %11 : vector<4xf32> to vector<4x1xf32>
    %cst_5 = arith.constant 3.125000e-02 : f32
    %13 = vector.broadcast %cst_5 : f32 to vector<4x1xf32>
    %14 = arith.mulf %12, %13 : vector<4x1xf32>
    %c0_6 = arith.constant 0 : index
    %c0_7 = arith.constant 0 : index
    %15 = vector.load %arg2[%c0_6, %c0_7] : memref<4x1xf32, #tpu.memory_space<vmem>>, vector<4x1xf32>
    %cst_8 = arith.constant 9.99999974E-6 : f32
    %16 = vector.broadcast %cst_8 : f32 to vector<4x1xf32>
    %17 = arith.addf %14, %16 : vector<4x1xf32>
    %18 = math.rsqrt %17 : vector<4x1xf32>
    %19 = arith.mulf %15, %18 : vector<4x1xf32>
    %20 = vector.broadcast %19 : vector<4x1xf32> to vector<4x128xf32>
    %21 = arith.mulf %9, %20 : vector<4x128xf32>
    %c0_9 = arith.constant 0 : index
    %c0_10 = arith.constant 0 : index
    %22 = vector.load %arg3[%c0_9, %c0_10] : memref<4x1xf32, #tpu.memory_space<vmem>>, vector<4x1xf32>
    %23 = vector.broadcast %22 : vector<4x1xf32> to vector<4x128xf32>
    %24 = arith.addf %21, %23 : vector<4x128xf32>
    %25 = vector.broadcast %0 : vector<1x128xf32> to vector<4x128xf32>
    %26 = arith.mulf %24, %25 : vector<4x128xf32>
    %cst_11 = arith.constant 0.000000e+00 : f32
    %27 = vector.broadcast %cst_11 : f32 to vector<16x128xf32>
    %c1_i32 = arith.constant 1 : i32
    %28 = tpu.dynamic_rotate %26 by %c1_i32 dim 1 : vector<4x128xf32>, i32 -> vector<4x128xf32>
    %c0_12 = arith.constant 0 : index
    %c0_13 = arith.constant 0 : index
    %c0_14 = arith.constant 0 : index
    %29 = vector.load %arg4[%c0_12, %c0_13, %c0_14] : memref<3x16x4xf32, #tpu.memory_space<vmem>>, vector<1x16x4xf32>
    %30 = vector.shape_cast %29 : vector<1x16x4xf32> to vector<16x4xf32>
    %cst_15 = arith.constant dense<0.000000e+00> : vector<16x128xf32>
    %31 = tpu.matmul %30, %28, %cst_15 {dimension_numbers = #tpu.dot_dimension_numbers<[1], [0], [0], [1], [0, 0, 1, 1], [], []>} : vector<16x4xf32>, vector<4x128xf32>, vector<16x128xf32> -> vector<16x128xf32>
    %32 = arith.addf %27, %31 : vector<16x128xf32>
    %c1 = arith.constant 1 : index
    %c0_16 = arith.constant 0 : index
    %c0_17 = arith.constant 0 : index
    %33 = vector.load %arg4[%c1, %c0_16, %c0_17] : memref<3x16x4xf32, #tpu.memory_space<vmem>>, vector<1x16x4xf32>
    %34 = vector.shape_cast %33 : vector<1x16x4xf32> to vector<16x4xf32>
    %cst_18 = arith.constant dense<0.000000e+00> : vector<16x128xf32>
    %35 = tpu.matmul %34, %26, %cst_18 {dimension_numbers = #tpu.dot_dimension_numbers<[1], [0], [0], [1], [0, 0, 1, 1], [], []>} : vector<16x4xf32>, vector<4x128xf32>, vector<16x128xf32> -> vector<16x128xf32>
    %36 = arith.addf %32, %35 : vector<16x128xf32>
    %c127_i32 = arith.constant 127 : i32
    %37 = tpu.dynamic_rotate %26 by %c127_i32 dim 1 : vector<4x128xf32>, i32 -> vector<4x128xf32>
    %c2 = arith.constant 2 : index
    %c0_19 = arith.constant 0 : index
    %c0_20 = arith.constant 0 : index
    %38 = vector.load %arg4[%c2, %c0_19, %c0_20] : memref<3x16x4xf32, #tpu.memory_space<vmem>>, vector<1x16x4xf32>
    %39 = vector.shape_cast %38 : vector<1x16x4xf32> to vector<16x4xf32>
    %cst_21 = arith.constant dense<0.000000e+00> : vector<16x128xf32>
    %40 = tpu.matmul %39, %37, %cst_21 {dimension_numbers = #tpu.dot_dimension_numbers<[1], [0], [0], [1], [0, 0, 1, 1], [], []>} : vector<16x4xf32>, vector<4x128xf32>, vector<16x128xf32> -> vector<16x128xf32>
    %41 = arith.addf %36, %40 : vector<16x128xf32>
    %c0_22 = arith.constant 0 : index
    %c0_23 = arith.constant 0 : index
    %42 = vector.load %arg5[%c0_22, %c0_23] : memref<16x1xf32, #tpu.memory_space<vmem>>, vector<16x1xf32>
    %43 = vector.broadcast %42 : vector<16x1xf32> to vector<16x128xf32>
    %44 = arith.addf %41, %43 : vector<16x128xf32>
    %cst_24 = arith.constant 0.000000e+00 : f32
    %45 = vector.broadcast %cst_24 : f32 to vector<16x128xf32>
    %46 = arith.maximumf %44, %45 : vector<16x128xf32>
    %47 = vector.broadcast %0 : vector<1x128xf32> to vector<16x128xf32>
    %48 = arith.mulf %46, %47 : vector<16x128xf32>
    %cst_25 = arith.constant dense<0.000000e+00> : vector<16xf32>
    %49 = vector.multi_reduction <add>, %48, %cst_25 [1] : vector<16x128xf32> to vector<16xf32>
    %50 = vector.shape_cast %49 : vector<16xf32> to vector<16x1xf32>
    %cst_26 = arith.constant 3.125000e-02 : f32
    %51 = vector.broadcast %cst_26 : f32 to vector<16x1xf32>
    %52 = arith.mulf %50, %51 : vector<16x1xf32>
    %53 = vector.broadcast %52 : vector<16x1xf32> to vector<16x128xf32>
    %54 = arith.subf %48, %53 : vector<16x128xf32>
    %55 = vector.broadcast %0 : vector<1x128xf32> to vector<16x128xf32>
    %56 = arith.mulf %54, %55 : vector<16x128xf32>
    %57 = arith.mulf %56, %56 : vector<16x128xf32>
    %cst_27 = arith.constant dense<0.000000e+00> : vector<16xf32>
    %58 = vector.multi_reduction <add>, %57, %cst_27 [1] : vector<16x128xf32> to vector<16xf32>
    %59 = vector.shape_cast %58 : vector<16xf32> to vector<16x1xf32>
    %cst_28 = arith.constant 3.125000e-02 : f32
    %60 = vector.broadcast %cst_28 : f32 to vector<16x1xf32>
    %61 = arith.mulf %59, %60 : vector<16x1xf32>
    %c0_29 = arith.constant 0 : index
    %c0_30 = arith.constant 0 : index
    %62 = vector.load %arg6[%c0_29, %c0_30] : memref<16x1xf32, #tpu.memory_space<vmem>>, vector<16x1xf32>
    %cst_31 = arith.constant 9.99999974E-6 : f32
    %63 = vector.broadcast %cst_31 : f32 to vector<16x1xf32>
    %64 = arith.addf %61, %63 : vector<16x1xf32>
    %65 = math.rsqrt %64 : vector<16x1xf32>
    %66 = arith.mulf %62, %65 : vector<16x1xf32>
    %67 = vector.broadcast %66 : vector<16x1xf32> to vector<16x128xf32>
    %68 = arith.mulf %56, %67 : vector<16x128xf32>
    %c0_32 = arith.constant 0 : index
    %c0_33 = arith.constant 0 : index
    %69 = vector.load %arg7[%c0_32, %c0_33] : memref<16x1xf32, #tpu.memory_space<vmem>>, vector<16x1xf32>
    %70 = vector.broadcast %69 : vector<16x1xf32> to vector<16x128xf32>
    %71 = arith.addf %68, %70 : vector<16x128xf32>
    %72 = vector.broadcast %0 : vector<1x128xf32> to vector<16x128xf32>
    %73 = arith.mulf %71, %72 : vector<16x128xf32>
    %cst_34 = arith.constant 0.000000e+00 : f32
    %74 = vector.broadcast %cst_34 : f32 to vector<32x128xf32>
    %c1_i32_35 = arith.constant 1 : i32
    %75 = tpu.dynamic_rotate %73 by %c1_i32_35 dim 1 : vector<16x128xf32>, i32 -> vector<16x128xf32>
    %c0_36 = arith.constant 0 : index
    %c0_37 = arith.constant 0 : index
    %c0_38 = arith.constant 0 : index
    %76 = vector.load %arg8[%c0_36, %c0_37, %c0_38] : memref<3x32x16xf32, #tpu.memory_space<vmem>>, vector<1x32x16xf32>
    %77 = vector.shape_cast %76 : vector<1x32x16xf32> to vector<32x16xf32>
    %cst_39 = arith.constant dense<0.000000e+00> : vector<32x128xf32>
    %78 = tpu.matmul %77, %75, %cst_39 {dimension_numbers = #tpu.dot_dimension_numbers<[1], [0], [0], [1], [0, 0, 1, 1], [], []>} : vector<32x16xf32>, vector<16x128xf32>, vector<32x128xf32> -> vector<32x128xf32>
    %79 = arith.addf %74, %78 : vector<32x128xf32>
    %c1_40 = arith.constant 1 : index
    %c0_41 = arith.constant 0 : index
    %c0_42 = arith.constant 0 : index
    %80 = vector.load %arg8[%c1_40, %c0_41, %c0_42] : memref<3x32x16xf32, #tpu.memory_space<vmem>>, vector<1x32x16xf32>
    %81 = vector.shape_cast %80 : vector<1x32x16xf32> to vector<32x16xf32>
    %cst_43 = arith.constant dense<0.000000e+00> : vector<32x128xf32>
    %82 = tpu.matmul %81, %73, %cst_43 {dimension_numbers = #tpu.dot_dimension_numbers<[1], [0], [0], [1], [0, 0, 1, 1], [], []>} : vector<32x16xf32>, vector<16x128xf32>, vector<32x128xf32> -> vector<32x128xf32>
    %83 = arith.addf %79, %82 : vector<32x128xf32>
    %c127_i32_44 = arith.constant 127 : i32
    %84 = tpu.dynamic_rotate %73 by %c127_i32_44 dim 1 : vector<16x128xf32>, i32 -> vector<16x128xf32>
    %c2_45 = arith.constant 2 : index
    %c0_46 = arith.constant 0 : index
    %c0_47 = arith.constant 0 : index
    %85 = vector.load %arg8[%c2_45, %c0_46, %c0_47] : memref<3x32x16xf32, #tpu.memory_space<vmem>>, vector<1x32x16xf32>
    %86 = vector.shape_cast %85 : vector<1x32x16xf32> to vector<32x16xf32>
    %cst_48 = arith.constant dense<0.000000e+00> : vector<32x128xf32>
    %87 = tpu.matmul %86, %84, %cst_48 {dimension_numbers = #tpu.dot_dimension_numbers<[1], [0], [0], [1], [0, 0, 1, 1], [], []>} : vector<32x16xf32>, vector<16x128xf32>, vector<32x128xf32> -> vector<32x128xf32>
    %88 = arith.addf %83, %87 : vector<32x128xf32>
    %c0_49 = arith.constant 0 : index
    %c0_50 = arith.constant 0 : index
    %89 = vector.load %arg9[%c0_49, %c0_50] : memref<32x1xf32, #tpu.memory_space<vmem>>, vector<32x1xf32>
    %90 = vector.broadcast %89 : vector<32x1xf32> to vector<32x128xf32>
    %91 = arith.addf %88, %90 : vector<32x128xf32>
    %cst_51 = arith.constant 0.000000e+00 : f32
    %92 = vector.broadcast %cst_51 : f32 to vector<32x128xf32>
    %93 = arith.maximumf %91, %92 : vector<32x128xf32>
    %94 = vector.broadcast %0 : vector<1x128xf32> to vector<32x128xf32>
    %95 = arith.mulf %93, %94 : vector<32x128xf32>
    %c0_52 = arith.constant 0 : index
    %c0_53 = arith.constant 0 : index
    %96 = vector.load %arg10[%c0_52, %c0_53] : memref<32x128xf32, #tpu.memory_space<vmem>>, vector<32x128xf32>
    tpu.vector_store %arg10[%c0_52, %c0_53], %95 {strides = array<i32>} : memref<32x128xf32, #tpu.memory_space<vmem>>, vector<32x128xf32>,
    return
  }
}

</mosaic_0001>

<bundles_post_ra>
// kernel: tpu_custom_call.1
= control target key start
LH: loop header
LB: loop body
LE: loop exit
PB: predicated region body
PF: predicated region fallthrough
CT: control target
= control target key end

     0   :  { %vm38_vm0 = vcmask 1043456   ;;  %s1135_s0 = inlined_call_operand.vmem [shape: f32[1,128], index: 0, kind: input, shape index: {}]   ;;  %s1136_s1 = inlined_call_operand.vmem [shape: f32[4,128], index: 1, kind: input, shape index: {}]   ;;  %s1137_s2 = inlined_call_operand.vmem [shape: f32[4,1], index: 2, kind: input, shape index: {}]   ;;  %s1138_s3 = inlined_call_operand.vmem [shape: f32[4,1], index: 3, kind: input, shape index: {}]   ;;  %s1139_s4 = inlined_call_operand.vmem [shape: f32[3,16,4], index: 4, kind: input, shape index: {}]   ;;  %s1140_s5 = inlined_call_operand.vmem [shape: f32[16,1], index: 5, kind: input, shape index: {}]   ;;  %s1141_s6 = inlined_call_operand.vmem [shape: f32[16,1], index: 6, kind: input, shape index: {}]   ;;  %s1142_s7 = inlined_call_operand.vmem [shape: f32[16,1], index: 7, kind: input, shape index: {}]   ;;  %s1143_s8 = inlined_call_operand.vmem [shape: f32[3,32,16], index: 8, kind: input, shape index: {}]   ;;  %s1144_s9 = inlined_call_operand.vmem [shape: f32[32,1], index: 9, kind: input, shape index: {}]   ;;  %s1145_s10 = inlined_call_operand.hbm [shape: f32[32,128], index: 10, kind: output, shape index: {}]  }
   0x1   :  { %v37_v0 = vld [vmem:[%s1136_s1] sm:$0xf] }
   0x2   :  { %15 = vsyncpa [#allocation3], 0  ;;  %v39_v1 = vsel %vm38_vm0, %v37_v0, 0.0  ;;  %v997_v4 = vld [vmem:[%s1135_s0] ss:$0 sm:$0xff]  ;;  %v929_v9 = vmov 0  }
   0x3   :  { %40 = vadd.xlane.f32.xlu0 %v39_v1  ;;  %899 = vset.pattern.permute.xlu1 %v929_v9  ;;  %v56_v13 = vld [vmem:[%s1137_s2] sm:$0xf]  ;;  %v788_v17 = vld [vmem:[%s1139_s4 + $0x10] sm:$0xff]  ;;  %vm81_vm1 = vcmask 31744   ;;  %s930_s2 = smov 127   ;;  %v789_v24 = vld [vmem:[%s1139_s4 + $0x18] sm:$0xff] }
   0x4   :  { %900 = vset.pattern.permute.xlu0 %v929_v9  ;;  %v66_v16 = vld [vmem:[%s1138_s3] sm:$0xf]  ;;  %850 = vmatprep.mubr.msk.f32.mxu0 %vm81_vm1, %v788_v17  ;;  %s931_s3 = smov 1   ;;  %v342_v25 = vld [vmem:[%s1140_s5 + $0x8] sm:$0xff]  ;;  %vm426_vm2 = vcmask 130048  }
   0x5   :  { %v76_v18 = vld [vmem:[%s1139_s4] sm:$0xff]  ;;  %v77_v30 = vld [vmem:[%s1139_s4 + $0x8] sm:$0xff] }
   0x6   :  { %855 = vmatprep.mubr.msk.f32.mxu1 %vm81_vm1, %v76_v18  ;;  %v796_v26 = vld [vmem:[%s1139_s4 + $0x20] sm:$0xff]  ;;  %v797_v31 = vld [vmem:[%s1139_s4 + $0x28] sm:$0xff] }
   0x7   :  { %v341_v27 = vld [vmem:[%s1140_s5] sm:$0xff]  ;;  %v398_v60 = vld [vmem:[%s1142_s7 + $0x8] sm:$0xff] }
   0x8   :  { %v731_v9 = vld [vmem:[%s1144_s9] sm:$0xff] }
   0x9   :  { %v417_v18 = vld [vmem:[%s1143_s8] sm:$0xff] }
  0x8c   :  { %v41_v2 = vpop.xlane.xlu0 %40 }
  0x8d   :  { %v42_v3 = vmul.f32 0.03125, %v41_v2 }
  0x8f   :  { %v43_v5 = vsub.f32 %v37_v0, %v42_v3  ;;  %v378_v3 = vld [vmem:[%s1141_s6 + $0x8] sm:$0xff] }
  0x91   :  { %v50_v6 = vmul.f32 %v997_v4, %v43_v5 }
  0x93   :  { %v51_v7 = vmul.f32 %v50_v6, %v50_v6 }
  0x95   :  { %v52_v8 = vsel %vm38_vm0, %v51_v7, 0.0  ;;  %v377_v7 = vld [vmem:[%s1141_s6] sm:$0xff] }
  0x96   :  { %53 = vadd.xlane.f32.xlu0 %v52_v8 }
 0x11f   :  { %v54_v10 = vpop.xlane.xlu0 %53 }
 0x120   :  { %v55_v11 = vmul.f32 0.03125, %v54_v10 }
 0x122   :  { %v57_v12 = vadd.f32 1e-05, %v55_v11  ;;  %v733_v11 = vld [vmem:[%s1144_s9 + $0x10] sm:$0xff] }
 0x124   :  { %901 = vrsqrt.f32 %v57_v12  ;;  %v397_v12 = vld [vmem:[%s1142_s7] sm:$0xff] }
 0x131   :  { %v902_v14 = vpop.eup %901 }
 0x132   :  { %v59_v15 = vmul.f32 %v902_v14, %v56_v13  ;;  %v801_v13 = vld [vmem:[%s1143_s8 + $0x20] sm:$0xff] }
 0x134   :  { %62 = vperm.xlu1 %899, %v59_v15  }
 0x138   :  { %69 = vperm.xlu1 %899, %v66_v16  }
 0x1af   :  { %v63_v19 = vpop.permute.xlu1 %62 }
 0x1b0   :  { %v65_v20 = vmul.f32 %v63_v19, %v50_v6 }
 0x1b3   :  { %v70_v21 = vpop.permute.xlu1 %69 }
 0x1b4   :  { %v72_v22 = vadd.f32 %v70_v21, %v65_v20 }
 0x1b6   :  { %v73_v23 = vmul.f32 %v997_v4, %v72_v22 }
 0x1b8   :  { %250 = vrot.lane.b32.xlu1 %v73_v23, %s930_s2  ;;  %74 = vrot.lane.b32.xlu0 %v73_v23, %s931_s3 }
 0x1b9   :  { %848 = vmatprep.subr.msk.mxu0 %vm38_vm0, %v73_v23 }
 0x1ba   :  { %849 = vmatpush3.msk.msra.mxu0 %vm38_vm0, %v73_v23 }
 0x1bb   :  { %851 = vmatmul.mubr.msk.f32.vlgmr.msra.gmra.mxu0 %vm81_vm1, %v789_v24 }
 0x1bc   :  { %350 = vperm.xlu1 %899, %v342_v25   ;;  %860 = vmatprep.mubr.msk.f32.mxu0 %vm81_vm1, %v796_v26  ;;  %v802_v25 = vld [vmem:[%s1143_s8 + $0x28] sm:$0xff]  ;;  %v803_v26 = vld [vmem:[%s1143_s8 + $0x30] sm:$0xff] }
 0x1c0   :  { %345 = vperm.xlu1 %899, %v341_v27   ;;  %v804_v27 = vld [vmem:[%s1143_s8 + $0x38] sm:$0xff] }
 0x22a   :  { %v251_v28 = vpop.permute.xlu1 %250  ;;  %v75_v29 = vpop.permute.xlu0 %74 }
 0x22b   :  { %853 = vmatprep.subr.msk.mxu1 %vm38_vm0, %v75_v29  ;;  %858 = vmatprep.subr.msk.mxu0 %vm38_vm0, %v251_v28 }
 0x22c   :  { %854 = vmatpush3.msk.msra.mxu1 %vm38_vm0, %v75_v29  ;;  %859 = vmatpush3.msk.msra.mxu0 %vm38_vm0, %v251_v28  ;;  %v813_v28 = vld [vmem:[%s1143_s8 + $0x40] sm:$0xff]  ;;  %v732_v29 = vld [vmem:[%s1144_s9 + $0x8] sm:$0xff] }
 0x22d   :  { %856 = vmatmul.mubr.msk.f32.vlgmr.msra.gmra.mxu1 %vm81_vm1, %v77_v30  ;;  %861 = vmatmul.mubr.msk.f32.vlgmr.msra.gmra.mxu0 %vm81_vm1, %v797_v31  ;;  %v734_v30 = vld [vmem:[%s1144_s9 + $0x18] sm:$0xff] }
 0x22e   :  { %867 = vmatprep.mubr.msk.f32.mxu1 %vm426_vm2, %v801_v13  ;;  %877 = vmatprep.mubr.msk.f32.mxu0 %vm426_vm2, %v417_v18 }
 0x237   :  { %v351_v34 = vpop.permute.xlu1 %350 }
 0x23b   :  { %v346_v44 = vpop.permute.xlu1 %345 }
 0x27b   :  { %v852_v32 = vpop.f32.mrf.mxu0 }
 0x27d   :  { %v157_v33 = vpop.f32.mrf.mxu0 }
 0x2ed   :  { %v857_v35 = vpop.f32.mrf.mxu1  ;;  %v862_v36 = vpop.f32.mrf.mxu0 }
 0x2ee   :  { %v247_v37 = vadd.f32 %v857_v35, %v852_v32  ;;  %v419_v35 = vld [vmem:[%s1143_s8 + $0x10] sm:$0xff] }
 0x2ef   :  { %v241_v38 = vpop.f32.mrf.mxu1  ;;  %v330_v41 = vpop.f32.mrf.mxu0 }
 0x2f0   :  { %v340_v39 = vadd.f32 %v862_v36, %v247_v37  ;;  %v242_v40 = vadd.f32 %v241_v38, %v157_v33  ;;  %v420_v37 = vld [vmem:[%s1143_s8 + $0x18] sm:$0xff]  ;;  %v814_v38 = vld [vmem:[%s1143_s8 + $0x48] sm:$0xff] }
 0x2f2   :  { %v354_v42 = vadd.f32 %v351_v34, %v340_v39  ;;  %v339_v43 = vadd.f32 %v330_v41, %v242_v40  ;;  %v418_v34 = vld [vmem:[%s1143_s8 + $0x8] sm:$0xff]  ;;  %v815_v39 = vld [vmem:[%s1143_s8 + $0x50] sm:$0xff]  ;;  %v816_v40 = vld [vmem:[%s1143_s8 + $0x58] sm:$0xff]  ;;  %s932_s8 = smov [#allocation2]  }
 0x2f3   :  { %s776_s22 = sshll.u32 %s932_s8, 4  ;;  %s777_s22 = int_to_ptr.vmem [resolvable:$true] %s776_s22 }
 0x2f4   :  { %v356_v45 = vmax.f32 %v354_v42, 0.0  ;;  %v353_v46 = vadd.f32 %v346_v44, %v339_v43  ;;  %s907_s6 = scalar_lea.vmem %s777_s22, 512  ;;  %p912_p1 = scmp.lt.s32.totalorder %s777_s22, %s777_s22 }
 0x2f5   :  { %p908_p0 = scmp.ne.s32.totalorder %s777_s22, %s907_s6  ;;  %p913_p2 = scmp.lt.s32.totalorder %s907_s6, %s907_s6 }
 0x2f6   :  { %v355_v47 = vmax.f32 %v353_v46, 0.0  ;;  %v358_v48 = vmul.f32 %v997_v4, %v356_v45 }
 0x2f7   :  { %p914_p3 = por %p913_p2, %p912_p1 }
 0x2f8   :  { %361 = vadd.xlane.f32.xlu1 %v358_v48  ;;  %v357_v49 = vmul.f32 %v997_v4, %v355_v47 }
 0x2f9   :  { %p915_p4 = pnand %p914_p3, %p908_p0 }
 0x2fa   :  { %359 = vadd.xlane.f32.xlu0 %v357_v49 }
 0x381   :  { %v362_v50 = vpop.xlane.xlu1 %361 }
 0x382   :  { %v364_v51 = vmul.f32 0.03125, %v362_v50 }
 0x383   :  { %v360_v52 = vpop.xlane.xlu0 %359 }
 0x384   :  { %v366_v53 = vsub.f32 %v358_v48, %v364_v51  ;;  %v363_v54 = vmul.f32 0.03125, %v360_v52 }
 0x386   :  { %v365_v55 = vsub.f32 %v357_v49, %v363_v54  ;;  %v368_v56 = vmul.f32 %v997_v4, %v366_v53 }
 0x388   :  { %v370_v57 = vmul.f32 %v368_v56, %v368_v56  ;;  %v367_v58 = vmul.f32 %v997_v4, %v365_v55 }
 0x38a   :  { %373 = vadd.xlane.f32.xlu1 %v370_v57  ;;  %v369_v59 = vmul.f32 %v367_v58, %v367_v58 }
 0x38e   :  { %371 = vadd.xlane.f32.xlu1 %v369_v59 }
 0x39f   :  { %406 = vperm.xlu1 %899, %v398_v60  }
 0x413   :  { %v374_v61 = vpop.xlane.xlu1 %373 }
 0x414   :  { %v376_v62 = vmul.f32 0.03125, %v374_v61 }
 0x416   :  { %v380_v63 = vadd.f32 1e-05, %v376_v62 }
 0x417   :  { %v372_v0 = vpop.xlane.xlu1 %371 }
 0x418   :  { %903 = vrsqrt.f32 %v380_v63  ;;  %v375_v1 = vmul.f32 0.03125, %v372_v0 }
 0x41a   :  { %v379_v2 = vadd.f32 1e-05, %v375_v1 }
 0x41b   :  { %v407_v14 = vpop.permute.xlu1 %406 }
 0x41c   :  { %905 = vrsqrt.f32 %v379_v2 }
 0x425   :  { %v904_v5 = vpop.eup %903 }
 0x426   :  { %v384_v6 = vmul.f32 %v904_v5, %v378_v3 }
 0x428   :  { %392 = vperm.xlu0 %900, %v384_v6  }
 0x429   :  { %v906_v8 = vpop.eup %905 }
 0x42a   :  { %v383_v10 = vmul.f32 %v906_v8, %v377_v7 }
 0x42c   :  { %737 = vperm.xlu0 %900, %v731_v9   ;;  %387 = vperm.xlu1 %899, %v383_v10  }
 0x430   :  { %747 = vperm.xlu0 %900, %v733_v11   ;;  %401 = vperm.xlu1 %899, %v397_v12  }
 0x4a3   :  { %v393_v15 = vpop.permute.xlu0 %392 }
 0x4a4   :  { %v396_v16 = vmul.f32 %v393_v15, %v368_v56 }
 0x4a6   :  { %v410_v17 = vadd.f32 %v407_v14, %v396_v16 }
 0x4a7   :  { %v388_v19 = vpop.permute.xlu1 %387  ;;  %v738_v51 = vpop.permute.xlu0 %737 }
 0x4a8   :  { %v412_v20 = vmul.f32 %v997_v4, %v410_v17  ;;  %v395_v21 = vmul.f32 %v388_v19, %v367_v58 }
 0x4aa   :  { %415 = vrot.lane.b32.xlu1 %v412_v20, %s931_s3  ;;  %863 = vmatprep.subr.mxu1 %v412_v20 }
 0x4ab   :  { %v402_v22 = vpop.permute.xlu1 %401  ;;  %864 = vmatpush3.msra.mxu1 %v412_v20  ;;  %v748_v7 = vpop.permute.xlu0 %747 }
 0x4ac   :  { %v409_v23 = vadd.f32 %v402_v22, %v395_v21 }
 0x4ae   :  { %v411_v24 = vmul.f32 %v997_v4, %v409_v23  ;;  %623 = vrot.lane.b32.xlu1 %v412_v20, %s930_s2 }
 0x4b0   :  { %865 = vmatprep.subr.mxu1 %v411_v24 }
 0x4b1   :  { %866 = vmatpush3.msra.mxu1 %v411_v24 }
 0x4b2   :  { %413 = vrot.lane.b32.xlu1 %v411_v24, %s931_s3  ;;  %868 = vmatmul.mubr.msk.f32.vlgmr.msra.gmra.mxu1 %vm426_vm2, %v802_v25 }
 0x4b3   :  { %870 = vmatprep.mubr.msk.f32.mxu1 %vm426_vm2, %v803_v26 }
 0x4b6   :  { %621 = vrot.lane.b32.xlu1 %v411_v24, %s930_s2  ;;  %871 = vmatmul.mubr.msk.f32.gmra.mxu1 %vm426_vm2, %v804_v27 }
 0x4b7   :  { %887 = vmatprep.mubr.msk.f32.mxu1 %vm426_vm2, %v813_v28 }
 0x4ba   :  { %742 = vperm.xlu1 %899, %v732_v29  }
 0x4be   :  { %752 = vperm.xlu1 %899, %v734_v30  }
 0x51c   :  { %v416_v31 = vpop.permute.xlu1 %415 }
 0x51d   :  { %873 = vmatprep.subr.mxu0 %v416_v31 }
 0x51e   :  { %874 = vmatpush3.msra.mxu0 %v416_v31 }
 0x520   :  { %v624_v32 = vpop.permute.xlu1 %623 }
 0x521   :  { %883 = vmatprep.subr.mxu1 %v624_v32 }
 0x522   :  { %884 = vmatpush3.msra.mxu1 %v624_v32 }
 0x524   :  { %v414_v33 = vpop.permute.xlu1 %413 }
 0x525   :  { %875 = vmatprep.subr.mxu0 %v414_v33 }
 0x526   :  { %876 = vmatpush3.msra.mxu0 %v414_v33 }
 0x527   :  { %878 = vmatmul.mubr.msk.f32.vlgmr.msra.gmra.mxu0 %vm426_vm2, %v418_v34 }
 0x528   :  { %v622_v36 = vpop.permute.xlu1 %621  ;;  %880 = vmatprep.mubr.msk.f32.mxu0 %vm426_vm2, %v419_v35 }
 0x529   :  { %885 = vmatprep.subr.mxu1 %v622_v36 }
 0x52a   :  { %886 = vmatpush3.msra.mxu1 %v622_v36 }
 0x52b   :  { %881 = vmatmul.mubr.msk.f32.gmra.mxu0 %vm426_vm2, %v420_v37  ;;  %888 = vmatmul.mubr.msk.f32.vlgmr.msra.gmra.mxu1 %vm426_vm2, %v814_v38 }
 0x52c   :  { %890 = vmatprep.mubr.msk.f32.mxu1 %vm426_vm2, %v815_v39 }
 0x52f   :  { %891 = vmatmul.mubr.msk.f32.gmra.mxu1 %vm426_vm2, %v816_v40 }
 0x535   :  { %v743_v47 = vpop.permute.xlu1 %742 }
 0x539   :  { %v753_v0 = vpop.permute.xlu1 %752 }
 0x572   :  { %v869_v41 = vpop.f32.mrf.mxu1 }
 0x574   :  { %v505_v42 = vpop.f32.mrf.mxu1 }
 0x576   :  { %v872_v43 = vpop.f32.mrf.mxu1 }
 0x578   :  { %v515_v45 = vpop.f32.mrf.mxu1 }
 0x5e7   :  { %v879_v44 = vpop.f32.mrf.mxu0 }
 0x5e8   :  { %v608_v48 = vadd.f32 %v879_v44, %v869_v41 }
 0x5e9   :  { %v602_v46 = vpop.f32.mrf.mxu0 }
 0x5ea   :  { %v603_v52 = vadd.f32 %v602_v46, %v505_v42 }
 0x5eb   :  { %v882_v49 = vpop.f32.mrf.mxu0  ;;  %v889_v50 = vpop.f32.mrf.mxu1 }
 0x5ec   :  { %v728_v53 = vadd.f32 %v889_v50, %v608_v48  ;;  %v618_v56 = vadd.f32 %v882_v49, %v872_v43 }
 0x5ed   :  { %v612_v54 = vpop.f32.mrf.mxu0  ;;  %v708_v55 = vpop.f32.mrf.mxu1 }
 0x5ee   :  { %v756_v57 = vadd.f32 %v743_v47, %v728_v53  ;;  %v727_v58 = vadd.f32 %v708_v55, %v603_v52  ;;  %v613_v61 = vadd.f32 %v612_v54, %v515_v45 }
 0x5ef   :  { %v892_v59 = vpop.f32.mrf.mxu1 }
 0x5f0   :  { %v760_v60 = vmax.f32 %v756_v57, 0.0  ;;  %v755_v62 = vadd.f32 %v738_v51, %v727_v58  ;;  %v730_v63 = vadd.f32 %v892_v59, %v618_v56 }
 0x5f1   :  { %v718_v1 = vpop.f32.mrf.mxu1 }
 0x5f2   :  { %v764_v2 = vmul.f32 %v997_v4, %v760_v60  ;;  %v759_v3 = vmax.f32 %v755_v62, 0.0  ;;  %v758_v5 = vadd.f32 %v753_v0, %v730_v63  ;;  %v729_v6 = vadd.f32 %v718_v1, %v613_v61 }
 0x5f4   :  { %768 = vst [vmem:[#allocation2 + $0x8] sm:$0xff] %v764_v2  ;;  %v763_v8 = vmul.f32 %v997_v4, %v759_v3  ;;  %v762_v9 = vmax.f32 %v758_v5, 0.0  ;;  %v757_v10 = vadd.f32 %v748_v7, %v729_v6 }
 0x5f6   :  { %767 = vst [vmem:[#allocation2] sm:$0xff] %v763_v8  ;;  %v766_v11 = vmul.f32 %v997_v4, %v762_v9  ;;  %v761_v12 = vmax.f32 %v757_v10, 0.0 }
 0x5f8   :  { %770 = vst [vmem:[#allocation2 + $0x18] sm:$0xff] %v766_v11  ;;  %v765_v13 = vmul.f32 %v997_v4, %v761_v12 }
 0x5fa   :  { %769 = vst [vmem:[#allocation2 + $0x10] sm:$0xff] %v765_v13 }
 0x5fb   :  { %918 = shalt.err (!%p915_p4)
}
 0x5fc   :  { %s933_s23 = smov 128   ;;  %s934_s24 = smov 8  }
 0x5fd   :  { %782 = dma.vmem_to_hbm [thread:$0]  %s777_s22, 512, %s1145_s10, [#allocation3], %s933_s23, %s933_s23, %s934_s24  }
 0x5fe   :  { %927 = dma.done.wait [#allocation3], 512  }
 0x5ff   :  { %928 = vsyncadd [#allocation3], 4294966784 }
 0x600   :  { %786 = vsyncpa [#allocation3], 1 }

</bundles_post_ra>
